<compile_context>
chip_gen: v7x
topology: tpu7x:2x2x1
jax: 0.10.0
libtpu: 0.0.40
codegen_flags: <defaults>
</compile_context>

<pallas_src>
import math
import functools

import jax
import jax.numpy as jnp
from jax.experimental import pallas as pl
from jax.experimental.pallas import tpu as pltpu


LANE = 128  # TPU vreg lane width


def _round_up(x, m):
    return ((x + m - 1) // m) * m


def _k_layout(h):
    """K-axis packing layout for the fused per-layer GRU gate matmuls.

    Returns (hp, off0, k0p, offl, klp):
      hp   -- lane-padded hidden width (multiple of 128)
      off0 -- K offsets of [seq, att_ctx, emotion, intent, h] for layer 0
      k0p  -- padded contraction depth of the layer-0 weight
      offl -- K offsets of [x, h] for layers >= 1
      klp  -- padded contraction depth of the layer>=1 weights
    When H divides 128 the sources are packed densely along K; otherwise they
    fall back to 128-aligned offsets (always correct, just more zero padding).
    """
    hp = _round_up(h, LANE)
    dense = (h <= LANE) and (LANE % h == 0)
    step = h if dense else hp
    off0 = [0, step, 2 * step, 3 * step, 4 * step]     # seq, att, emo, int, h
    k0p = _round_up(off0[-1] + h, LANE)
    offl = [0, step]                                    # x, h
    klp = _round_up(offl[-1] + h, LANE)
    return hp, off0, k0p, offl, klp


# ---------------------------------------------------------------------------
# One-time preparation (hoisted out of the per-token decode step).
# ---------------------------------------------------------------------------
def prepare_decoder_params(gru_params, num_layers, hidden_size,
                           weight_dtype=jnp.bfloat16):
    """Pack torch-layout GRU weights into one K-packed [Kp, 4*hp] matrix and
    one [1, 4*hp] bias per layer.  Gate columns are four 128-aligned blocks
    [r | z | i_n | h_n], so  gates = x_packed @ W + b  already contains
    (i_r + h_r) and (i_z + h_z) and the kernel's gate slices are lane-aligned.

    Returned flat list: [W0, b0, W1, b1, ...] (consumed positionally)."""
    h = hidden_size
    hp, off0, k0p, offl, klp = _k_layout(h)

    packed = []
    for l in range(num_layers):
        w_ih, w_hh, b_ih, b_hh = (jnp.asarray(a, jnp.float32) for a in gru_params[l])
        wt_i, wt_h = w_ih.T, w_hh.T                     # [in_dim, 3H], [H, 3H]
        if l == 0:
            kp = k0p
            # torch input order: cat([seq, att_ctx, emotion, intent])
            srcs = [(off0[i], wt_i[i * h:(i + 1) * h]) for i in range(4)]
            srcs.append((off0[4], wt_h))
        else:
            kp = klp
            srcs = [(offl[0], wt_i), (offl[1], wt_h)]

        w = jnp.zeros((kp, 4 * hp), jnp.float32)
        for j, (off, wt) in enumerate(srcs):
            n_slot = 3 if j == len(srcs) - 1 else 2     # recurrent h_n -> slot 3
            w = w.at[off:off + h, 0 * hp:0 * hp + h].set(wt[:, 0:h])        # r
            w = w.at[off:off + h, 1 * hp:1 * hp + h].set(wt[:, h:2 * h])    # z
            w = w.at[off:off + h, n_slot * hp:n_slot * hp + h].set(wt[:, 2 * h:3 * h])

        b = jnp.zeros((1, 4 * hp), jnp.float32)
        b = b.at[0, 0 * hp:0 * hp + h].set(b_ih[0:h] + b_hh[0:h])
        b = b.at[0, 1 * hp:1 * hp + h].set(b_ih[h:2 * h] + b_hh[h:2 * h])
        b = b.at[0, 2 * hp:2 * hp + h].set(b_ih[2 * h:3 * h])
        b = b.at[0, 3 * hp:3 * hp + h].set(b_hh[2 * h:3 * h])

        packed += [w.astype(weight_dtype), b]
    return packed


def prepare_decoder_context(context, hidden_size):
    """One-time per dialogue: lane-pad + bf16-cast the encoder context."""
    h = context.shape[-1]
    hp = _round_up(hidden_size, LANE)
    ctx = jnp.asarray(context, jnp.float32)
    if hp != h:
        ctx = jnp.pad(ctx, ((0, 0), (0, 0), (0, hp - h)))
    return ctx.astype(jnp.bfloat16)


def prepare_decoder_state(state, hidden_size):
    """One-time: lane-pad the initial GRU state.  The decode step keeps the
    state in padded [L, B, HP] layout between tokens."""
    h = state.shape[-1]
    hp = _round_up(hidden_size, LANE)
    st = jnp.asarray(state, jnp.float32)
    if hp != h:
        st = jnp.pad(st, ((0, 0), (0, 0), (0, hp - h)))
    return st


# ---------------------------------------------------------------------------
# Kernel
# ---------------------------------------------------------------------------
def _decoder_kernel(num_layers, hp, att_off, h0_off, hrec_off, *refs):
    """refs = (x0_static, context, state, mask, W0, b0, [Wl, bl]..., state_out)."""
    x0_ref, ctx_ref, state_ref, mask_ref = refs[:4]
    w_refs = refs[4:4 + 2 * num_layers]
    state_out_ref = refs[4 + 2 * num_layers]

    f32, bf16 = jnp.float32, jnp.bfloat16

    state = state_ref[...]                                # [L, TB, HP] f32
    ctx = ctx_ref[...].astype(f32)                        # [TB, S, HP]

    # ---- attention on VPU/XLU slots (tiny FLOPs; keeps the MXU free and ----
    # ---- avoids degenerate [1,HP]x[HP,S] batched matmuls) ------------------
    s_mean = jnp.mean(state, axis=0)                      # [TB, HP]
    scores = jnp.sum(ctx * s_mean[:, None, :], axis=-1, keepdims=True)   # [TB,S,1]
    scores = scores - jnp.max(scores, axis=1, keepdims=True)
    e = jnp.exp(scores)
    inv = pl.reciprocal(jnp.sum(e, axis=1, keepdims=True), approx=True)  # EUP slot
    att = e * inv * mask_ref[...]                         # mask AFTER softmax (torch)
    att_ctx = jnp.sum(att * ctx, axis=1)                  # [TB, HP]

    def place(slab, sources):
        """Add [TB, HP] sources (data in lanes [0,H), zeros above) into `slab`
        at their packed K offsets; 128-aligned offsets are direct adds,
        intra-block offsets are a single XLU lane roll."""
        nblk = slab.shape[-1] // LANE
        blocks = [slab[:, j * LANE:(j + 1) * LANE] for j in range(nblk)]
        for off, src in sources:
            j, local = off // LANE, off % LANE
            if local == 0:
                for k in range(src.shape[-1] // LANE):
                    blocks[j + k] = blocks[j + k] + src[:, k * LANE:(k + 1) * LANE]
            else:                                         # dense mode => HP == LANE
                blocks[j] = blocks[j] + pltpu.roll(src, local, axis=1)
        return blocks[0] if nblk == 1 else jnp.concatenate(blocks, axis=-1)

    def gate_matmul(x, w_ref, b_ref):
        g = jnp.dot(x.astype(bf16), w_ref[...], preferred_element_type=f32)
        return g + b_ref[...]

    def gru_cell(g, h_prev):
        # gate blocks are 128-lane aligned: [r | z | i_n | h_n]
        r = jax.nn.sigmoid(g[:, 0 * hp:1 * hp])
        z = jax.nn.sigmoid(g[:, 1 * hp:2 * hp])
        n = jnp.tanh(g[:, 2 * hp:3 * hp] + r * g[:, 3 * hp:4 * hp])
        return (1.0 - z) * n + z * h_prev

    # ---- layer 0: ONE K-packed matmul [TB, K0p] @ [K0p, 4*HP] --------------
    h_prev = state[0]
    x_in = place(x0_ref[...], [(att_off, att_ctx), (h0_off, h_prev)])
    x = gru_cell(gate_matmul(x_in, w_refs[0], w_refs[1]), h_prev)
    state_out_ref[0] = x

    # ---- layers >= 1: ONE K-packed matmul each -----------------------------
    for l in range(1, num_layers):
        h_prev = state[l]
        klp = w_refs[2 * l].shape[0]
        base = jnp.zeros((x.shape[0], klp), f32)
        x_in = place(base, [(0, x), (hrec_off, h_prev)])
        x = gru_cell(gate_matmul(x_in, w_refs[2 * l], w_refs[2 * l + 1]), h_prev)
        state_out_ref[l] = x


# ---------------------------------------------------------------------------
# Wrapper (per decode step)
# ---------------------------------------------------------------------------
def _pick_batch_tile(b, s_len, hp, num_cores):
    tb = b
    # grid > 1 only pays off on v7x (2 TensorCores); on v5e/v6e each extra
    # grid step is ~0.35us of serial pipeline overhead with no benefit.
    if num_cores >= 2 and b % 2 == 0 and (b // 2) % 8 == 0:
        tb = b // 2
    # keep the double-buffered bf16 context block comfortably under v5e's
    # 16 MiB default scoped VMEM (and v7x's 64 MiB physical VMEM).
    while tb % 16 == 0 and 2 * tb * s_len * hp * 2 > (8 << 20):
        tb //= 2
    return tb


def _vmem_limit_bytes(tb, s_len, hp, k0p, num_layers, packed_weights):
    blk = (tb * k0p * 4 + tb * s_len * hp * 2 + num_layers * tb * hp * 4
           + tb * s_len * 4 + num_layers * tb * hp * 4)
    wb = sum(math.prod(w.shape) * w.dtype.itemsize for w in packed_weights)
    interm = tb * s_len * hp * 8 + 16 * tb * hp * 4      # f32 ctx + gates headroom
    return int(min(max(2 * blk + 2 * wb + interm + (8 << 20), 16 << 20), 96 << 20))


def emotion_intent_decoder_forward(seq, emotion_emb, intent_emb, context_p, state_p,
                                   mask, emb_table, packed_weights, *,
                                   num_layers, hidden_size, num_cores=1):
    """One decode step.

    `context_p` / `state_p` are the lane-padded forms from
    prepare_decoder_context / prepare_decoder_state; the returned state stays
    padded [L, B, HP] and is fed back as-is next step (slice [..., :H] only
    when the unpadded state is needed).  Set num_cores=2 on v7x to shard the
    batch across both TensorCores.
    Returns (output [B, 1, H], new_state_padded [L, B, HP])."""
    h = hidden_size
    L = num_layers
    hp, off0, k0p, offl, _ = _k_layout(h)
    b, s_len, hp_c = context_p.shape
    assert hp_c == hp and state_p.shape == (L, b, hp)

    f32 = jnp.float32
    # TODO(synk): the nn.Embedding token gather stays as plain-JAX glue; it could
    # be folded into the kernel via PrefetchScalarGridSpec + pl.Element rows, but
    # the [B, H] gather is negligible next to the GRU matmuls.
    seq_emb = jnp.take(emb_table, seq, axis=0).astype(f32)             # [B, H]

    # static part of the layer-0 K-packed input: [seq | 0(att) | emo | int | 0(h)]
    x0_static = jnp.zeros((b, k0p), f32)
    x0_static = x0_static.at[:, off0[0]:off0[0] + h].set(seq_emb)
    x0_static = x0_static.at[:, off0[2]:off0[2] + h].set(emotion_emb.astype(f32))
    x0_static = x0_static.at[:, off0[3]:off0[3] + h].set(intent_emb.astype(f32))
    mask3 = mask.astype(f32)[:, :, None]                               # [B, S, 1]

    tb = _pick_batch_tile(b, s_len, hp, num_cores)
    grid = (b // tb,)

    in_specs = [
        pl.BlockSpec((tb, k0p), lambda i: (i, 0)),                     # x0_static
        pl.BlockSpec((tb, s_len, hp), lambda i: (i, 0, 0)),            # context (bf16)
        pl.BlockSpec((L, tb, hp), lambda i: (0, i, 0)),                # state
        pl.BlockSpec((tb, s_len, 1), lambda i: (i, 0, 0)),             # mask
    ]
    # weights/biases: constant block index -> fetched once, resident across grid
    in_specs += [pl.BlockSpec(w.shape, lambda i: (0, 0)) for w in packed_weights]

    out_specs = pl.BlockSpec((L, tb, hp), lambda i: (0, i, 0))         # new state
    out_shape = jax.ShapeDtypeStruct((L, b, hp), f32)

    new_state = pl.pallas_call(
        functools.partial(_decoder_kernel, L, hp, off0[1], off0[4], offl[1]),
        out_shape=out_shape,
        grid=grid,
        in_specs=in_specs,
        out_specs=out_specs,
        compiler_params=pltpu.CompilerParams(
            dimension_semantics=("parallel",),
            vmem_limit_bytes=_vmem_limit_bytes(tb, s_len, hp, k0p, L,
                                               packed_weights)),
    )(x0_static, context_p, state_p, mask3, *packed_weights)

    # GRU output (batch_first, seq len 1) == last layer's new hidden state.
    out = new_state[L - 1][:, None, :h]
    return out, new_state


# ---------------------------------------------------------------------------
# Pure-JAX reference (mirrors the PyTorch module)
# ---------------------------------------------------------------------------
def _reference(seq, emotion_emb, intent_emb, context, state, mask, emb_table,
               gru_params, num_layers, hidden_size, match_bf16_matmul=False):
    """With match_bf16_matmul=True, operands are rounded to bf16 exactly where
    the kernel rounds them (context storage and GRU matmul operands), with f32
    accumulation everywhere, isolating kernel logic from the bf16 policy."""
    if match_bf16_matmul:
        q = lambda a: a.astype(jnp.bfloat16).astype(jnp.float32)
    else:
        q = lambda a: a
    hs = hidden_size
    seq_emb = jnp.take(emb_table, seq, axis=0)
    ctx = q(context)
    s = jnp.mean(state, axis=0)
    scores = jnp.einsum('bsh,bh->bs', ctx, s)
    att = jax.nn.softmax(scores, axis=-1) * mask
    att_ctx = jnp.einsum('bs,bsh->bh', att, ctx)
    x = jnp.concatenate([seq_emb, att_ctx, emotion_emb, intent_emb], axis=-1)
    new_states = []
    for l in range(num_layers):
        w_ih, w_hh, b_ih, b_hh = gru_params[l]
        hh = state[l]
        gi = q(x) @ q(w_ih).T + b_ih
        gh = q(hh) @ q(w_hh).T + b_hh
        r = jax.nn.sigmoid(gi[:, :hs] + gh[:, :hs])
        z = jax.nn.sigmoid(gi[:, hs:2 * hs] + gh[:, hs:2 * hs])
        n = jnp.tanh(gi[:, 2 * hs:] + r * gh[:, 2 * hs:])
        h_new = (1.0 - z) * n + z * hh
        new_states.append(h_new)
        x = h_new
    return x[:, None, :], jnp.stack(new_states, axis=0)


if __name__ == "__main__":
    B, S, H, L, V, PAD = 2, 8, 32, 2, 16, 0

    key = jax.random.PRNGKey(0)
    ks = jax.random.split(key, 8)

    emb_table = 0.1 * jax.random.normal(ks[0], (V, H), jnp.float32)
    emb_table = emb_table.at[PAD].set(0.0)               # padding_idx row zeroed
    seq = jax.random.randint(ks[1], (B,), 0, V, dtype=jnp.int32)
    emotion_emb = jax.random.normal(ks[2], (B, H), jnp.float32)
    intent_emb = jax.random.normal(ks[3], (B, H), jnp.float32)
    context = jax.random.normal(ks[4], (B, S, H), jnp.float32)
    state = jax.random.normal(ks[5], (L, B, H), jnp.float32)
    mask = (jax.random.uniform(ks[6], (B, S)) > 0.3).astype(jnp.float32)

    # GRU parameters (PyTorch layout / init scale), deterministic.
    bound = 1.0 / math.sqrt(H)
    kw = jax.random.split(ks[7], 4 * L)
    gru_params = []
    for l in range(L):
        in_dim = 4 * H if l == 0 else H
        w_ih = jax.random.uniform(kw[4 * l + 0], (3 * H, in_dim), jnp.float32, -bound, bound)
        w_hh = jax.random.uniform(kw[4 * l + 1], (3 * H, H), jnp.float32, -bound, bound)
        b_ih = jax.random.uniform(kw[4 * l + 2], (3 * H,), jnp.float32, -bound, bound)
        b_hh = jax.random.uniform(kw[4 * l + 3], (3 * H,), jnp.float32, -bound, bound)
        gru_params.append((w_ih, w_hh, b_ih, b_hh))

    # One-time preparation (all hoisted out of the per-token decode loop).
    packed = prepare_decoder_params(gru_params, L, H, weight_dtype=jnp.bfloat16)
    ctx_p = prepare_decoder_context(context, H)
    state_p = prepare_decoder_state(state, H)

    step = jax.jit(functools.partial(emotion_intent_decoder_forward,
                                     num_layers=L, hidden_size=H, num_cores=1))
    out, new_state_p = step(seq, emotion_emb, intent_emb, ctx_p, state_p, mask,
                            emb_table, packed)
    jax.block_until_ready((out, new_state_p))
    new_state = new_state_p[..., :H]

    # Tight check vs a reference using the same bf16 matmul-operand rounding.
    ref_out, ref_state = _reference(seq, emotion_emb, intent_emb, context, state,
                                    mask, emb_table, gru_params, L, H,
                                    match_bf16_matmul=True)
    assert jnp.allclose(out, ref_out, rtol=5e-3, atol=5e-3), "output mismatch (bf16-matched ref)"
    assert jnp.allclose(new_state, ref_state, rtol=5e-3, atol=5e-3), "state mismatch (bf16-matched ref)"

    # Loose check vs the pure-f32 reference (difference = bf16 operand rounding).
    ref_out32, ref_state32 = _reference(seq, emotion_emb, intent_emb, context, state,
                                        mask, emb_table, gru_params, L, H,
                                        match_bf16_matmul=False)
    assert jnp.allclose(out, ref_out32, rtol=5e-2, atol=5e-2), "output mismatch (f32 ref)"
    assert jnp.allclose(new_state, ref_state32, rtol=5e-2, atol=5e-2), "state mismatch (f32 ref)"

    print("KERNEL_OK")
</pallas_src>

<mosaic_0001>
module attributes {stable_mosaic.version = 11 : i64} {
  func.func @_decoder_kernel(%arg0: i32, %arg1: memref<2x256xf32, #tpu.memory_space<vmem>>, %arg2: memref<2x8x128xbf16, #tpu.memory_space<vmem>>, %arg3: memref<2x2x128xf32, #tpu.memory_space<vmem>>, %arg4: memref<2x8x1xf32, #tpu.memory_space<vmem>>, %arg5: memref<256x512xbf16, #tpu.memory_space<vmem>>, %arg6: memref<1x512xf32, #tpu.memory_space<vmem>>, %arg7: memref<128x512xbf16, #tpu.memory_space<vmem>>, %arg8: memref<1x512xf32, #tpu.memory_space<vmem>>, %arg9: memref<2x2x128xf32, #tpu.memory_space<vmem>>) attributes {dimension_semantics = [#tpu.dimension_semantics<parallel>], iteration_bounds = array<i64: 1>, scalar_prefetch = 0 : i64, scratch_operands = 0 : i64, tpu.core_type = #tpu.core_type<tc>, window_params = [{transform_indices = @transform_0, window_bounds = array<i64: 2, 256>}, {transform_indices = @transform_1, window_bounds = array<i64: 2, 8, 128>}, {transform_indices = @transform_2, window_bounds = array<i64: 2, 2, 128>}, {transform_indices = @transform_3, window_bounds = array<i64: 2, 8, 1>}, {pipeline_mode = #tpu.pipeline_mode<synchronous>, transform_indices = @transform_4, window_bounds = array<i64: 256, 512>}, {pipeline_mode = #tpu.pipeline_mode<synchronous>, transform_indices = @transform_5, window_bounds = array<i64: 1, 512>}, {pipeline_mode = #tpu.pipeline_mode<synchronous>, transform_indices = @transform_6, window_bounds = array<i64: 128, 512>}, {pipeline_mode = #tpu.pipeline_mode<synchronous>, transform_indices = @transform_7, window_bounds = array<i64: 1, 512>}, {transform_indices = @transform_8, window_bounds = array<i64: 2, 2, 128>}]} {
    %c0 = arith.constant 0 : index
    %c0_0 = arith.constant 0 : index
    %c0_1 = arith.constant 0 : index
    %0 = vector.load %arg3[%c0, %c0_0, %c0_1] : memref<2x2x128xf32, #tpu.memory_space<vmem>>, vector<2x2x128xf32>
    %c0_2 = arith.constant 0 : index
    %c0_3 = arith.constant 0 : index
    %c0_4 = arith.constant 0 : index
    %1 = vector.load %arg2[%c0_2, %c0_3, %c0_4] : memref<2x8x128xbf16, #tpu.memory_space<vmem>>, vector<2x8x128xbf16>
    %2 = arith.extf %1 : vector<2x8x128xbf16> to vector<2x8x128xf32>
    %cst = arith.constant dense<0.000000e+00> : vector<2x128xf32>
    %3 = vector.multi_reduction <add>, %0, %cst [0] : vector<2x2x128xf32> to vector<2x128xf32>
    %cst_5 = arith.constant 2.000000e+00 : f32
    %4 = vector.broadcast %cst_5 : f32 to vector<2x128xf32>
    %5 = arith.divf %3, %4 : vector<2x128xf32>
    %6 = vector.shape_cast %5 : vector<2x128xf32> to vector<2x1x128xf32>
    %7 = vector.broadcast %6 : vector<2x1x128xf32> to vector<2x8x128xf32>
    %8 = arith.mulf %2, %7 : vector<2x8x128xf32>
    %cst_6 = arith.constant dense<0.000000e+00> : vector<2x8xf32>
    %9 = vector.multi_reduction <add>, %8, %cst_6 [2] : vector<2x8x128xf32> to vector<2x8xf32>
    %10 = vector.shape_cast %9 : vector<2x8xf32> to vector<2x8x1xf32>
    %cst_7 = arith.constant dense<0xFF800000> : vector<2x1xf32>
    %11 = vector.multi_reduction <maximumf>, %10, %cst_7 [1] : vector<2x8x1xf32> to vector<2x1xf32>
    %12 = vector.shape_cast %11 : vector<2x1xf32> to vector<2x1x1xf32>
    %13 = vector.broadcast %12 : vector<2x1x1xf32> to vector<2x8x1xf32>
    %14 = arith.subf %10, %13 : vector<2x8x1xf32>
    %15 = math.exp %14 : vector<2x8x1xf32>
    %cst_8 = arith.constant dense<0.000000e+00> : vector<2x1xf32>
    %16 = vector.multi_reduction <add>, %15, %cst_8 [1] : vector<2x8x1xf32> to vector<2x1xf32>
    %17 = vector.shape_cast %16 : vector<2x1xf32> to vector<2x1x1xf32>
    %18 = tpu.reciprocal %17 {approx = true} : vector<2x1x1xf32> -> vector<2x1x1xf32>
    %19 = vector.broadcast %18 : vector<2x1x1xf32> to vector<2x8x1xf32>
    %20 = arith.mulf %15, %19 : vector<2x8x1xf32>
    %c0_9 = arith.constant 0 : index
    %c0_10 = arith.constant 0 : index
    %c0_11 = arith.constant 0 : index
    %21 = vector.load %arg4[%c0_9, %c0_10, %c0_11] : memref<2x8x1xf32, #tpu.memory_space<vmem>>, vector<2x8x1xf32>
    %22 = arith.mulf %20, %21 : vector<2x8x1xf32>
    %23 = vector.broadcast %22 : vector<2x8x1xf32> to vector<2x8x128xf32>
    %24 = arith.mulf %23, %2 : vector<2x8x128xf32>
    %cst_12 = arith.constant dense<0.000000e+00> : vector<2x128xf32>
    %25 = vector.multi_reduction <add>, %24, %cst_12 [1] : vector<2x8x128xf32> to vector<2x128xf32>
    %26 = vector.extract_strided_slice %0 {offsets = [0, 0, 0], sizes = [1, 2, 128], strides = [1, 1, 1]} : vector<2x2x128xf32> to vector<1x2x128xf32>
    %27 = vector.shape_cast %26 : vector<1x2x128xf32> to vector<2x128xf32>
    %c0_13 = arith.constant 0 : index
    %c0_14 = arith.constant 0 : index
    %28 = vector.load %arg1[%c0_13, %c0_14] : memref<2x256xf32, #tpu.memory_space<vmem>>, vector<2x256xf32>
    %29 = vector.extract_strided_slice %28 {offsets = [0, 0], sizes = [2, 128], strides = [1, 1]} : vector<2x256xf32> to vector<2x128xf32>
    %30 = vector.extract_strided_slice %28 {offsets = [0, 128], sizes = [2, 128], strides = [1, 1]} : vector<2x256xf32> to vector<2x128xf32>
    %c32_i32 = arith.constant 32 : i32
    %31 = tpu.dynamic_rotate %25 by %c32_i32 dim 1 : vector<2x128xf32>, i32 -> vector<2x128xf32>
    %32 = arith.addf %29, %31 : vector<2x128xf32>
    %33 = arith.addf %30, %27 : vector<2x128xf32>
    %34 = tpu.concatenate %32, %33 in 1 : vector<2x128xf32>, vector<2x128xf32> -> vector<2x256xf32>
    %35 = arith.truncf %34 : vector<2x256xf32> to vector<2x256xbf16>
    %c0_15 = arith.constant 0 : index
    %c0_16 = arith.constant 0 : index
    %36 = vector.load %arg5[%c0_15, %c0_16] : memref<256x512xbf16, #tpu.memory_space<vmem>>, vector<256x512xbf16>
    %cst_17 = arith.constant dense<0.000000e+00> : vector<2x512xf32>
    %37 = tpu.matmul %35, %36, %cst_17 {dimension_numbers = #tpu.dot_dimension_numbers<[1], [0], [0], [1], [0, 0, 1, 1], [], []>} : vector<2x256xbf16>, vector<256x512xbf16>, vector<2x512xf32> -> vector<2x512xf32>
    %c0_18 = arith.constant 0 : index
    %c0_19 = arith.constant 0 : index
    %38 = vector.load %arg6[%c0_18, %c0_19] : memref<1x512xf32, #tpu.memory_space<vmem>>, vector<1x512xf32>
    %39 = vector.broadcast %38 : vector<1x512xf32> to vector<2x512xf32>
    %40 = arith.addf %37, %39 : vector<2x512xf32>
    %41 = vector.extract_strided_slice %40 {offsets = [0, 0], sizes = [2, 128], strides = [1, 1]} : vector<2x512xf32> to vector<2x128xf32>
    %42 = arith.negf %41 : vector<2x128xf32>
    %43 = math.exp %42 : vector<2x128xf32>
    %cst_20 = arith.constant 1.000000e+00 : f32
    %44 = vector.broadcast %cst_20 : f32 to vector<2x128xf32>
    %45 = arith.addf %44, %43 : vector<2x128xf32>
    %46 = arith.divf %44, %45 : vector<2x128xf32>
    %47 = vector.extract_strided_slice %40 {offsets = [0, 128], sizes = [2, 128], strides = [1, 1]} : vector<2x512xf32> to vector<2x128xf32>
    %48 = arith.negf %47 : vector<2x128xf32>
    %49 = math.exp %48 : vector<2x128xf32>
    %cst_21 = arith.constant 1.000000e+00 : f32
    %50 = vector.broadcast %cst_21 : f32 to vector<2x128xf32>
    %51 = arith.addf %50, %49 : vector<2x128xf32>
    %52 = arith.divf %50, %51 : vector<2x128xf32>
    %53 = vector.extract_strided_slice %40 {offsets = [0, 256], sizes = [2, 128], strides = [1, 1]} : vector<2x512xf32> to vector<2x128xf32>
    %54 = vector.extract_strided_slice %40 {offsets = [0, 384], sizes = [2, 128], strides = [1, 1]} : vector<2x512xf32> to vector<2x128xf32>
    %55 = arith.mulf %46, %54 : vector<2x128xf32>
    %56 = arith.addf %53, %55 : vector<2x128xf32>
    %57 = math.tanh %56 : vector<2x128xf32>
    %cst_22 = arith.constant 1.000000e+00 : f32
    %58 = vector.broadcast %cst_22 : f32 to vector<2x128xf32>
    %59 = arith.subf %58, %52 : vector<2x128xf32>
    %60 = arith.mulf %59, %57 : vector<2x128xf32>
    %61 = arith.mulf %52, %27 : vector<2x128xf32>
    %62 = arith.addf %60, %61 : vector<2x128xf32>
    %c0_23 = arith.constant 0 : index
    %c0_24 = arith.constant 0 : index
    %c0_25 = arith.constant 0 : index
    %63 = vector.load %arg9[%c0_23, %c0_24, %c0_25] : memref<2x2x128xf32, #tpu.memory_space<vmem>>, vector<1x2x128xf32>
    %64 = vector.shape_cast %63 : vector<1x2x128xf32> to vector<2x128xf32>
    %65 = vector.shape_cast %62 : vector<2x128xf32> to vector<1x2x128xf32>
    tpu.vector_store %arg9[%c0_23, %c0_24, %c0_25], %65 {strides = array<i32>} : memref<2x2x128xf32, #tpu.memory_space<vmem>>, vector<1x2x128xf32>,
    %66 = vector.extract_strided_slice %0 {offsets = [1, 0, 0], sizes = [1, 2, 128], strides = [1, 1, 1]} : vector<2x2x128xf32> to vector<1x2x128xf32>
    %67 = vector.shape_cast %66 : vector<1x2x128xf32> to vector<2x128xf32>
    %cst_26 = arith.constant 0.000000e+00 : f32
    %68 = vector.broadcast %cst_26 : f32 to vector<2x128xf32>
    %69 = arith.addf %68, %62 : vector<2x128xf32>
    %c32_i32_27 = arith.constant 32 : i32
    %70 = tpu.dynamic_rotate %67 by %c32_i32_27 dim 1 : vector<2x128xf32>, i32 -> vector<2x128xf32>
    %71 = arith.addf %69, %70 : vector<2x128xf32>
    %72 = arith.truncf %71 : vector<2x128xf32> to vector<2x128xbf16>
    %c0_28 = arith.constant 0 : index
    %c0_29 = arith.constant 0 : index
    %73 = vector.load %arg7[%c0_28, %c0_29] : memref<128x512xbf16, #tpu.memory_space<vmem>>, vector<128x512xbf16>
    %cst_30 = arith.constant dense<0.000000e+00> : vector<2x512xf32>
    %74 = tpu.matmul %72, %73, %cst_30 {dimension_numbers = #tpu.dot_dimension_numbers<[1], [0], [0], [1], [0, 0, 1, 1], [], []>} : vector<2x128xbf16>, vector<128x512xbf16>, vector<2x512xf32> -> vector<2x512xf32>
    %c0_31 = arith.constant 0 : index
    %c0_32 = arith.constant 0 : index
    %75 = vector.load %arg8[%c0_31, %c0_32] : memref<1x512xf32, #tpu.memory_space<vmem>>, vector<1x512xf32>
    %76 = vector.broadcast %75 : vector<1x512xf32> to vector<2x512xf32>
    %77 = arith.addf %74, %76 : vector<2x512xf32>
    %78 = vector.extract_strided_slice %77 {offsets = [0, 0], sizes = [2, 128], strides = [1, 1]} : vector<2x512xf32> to vector<2x128xf32>
    %79 = arith.negf %78 : vector<2x128xf32>
    %80 = math.exp %79 : vector<2x128xf32>
    %cst_33 = arith.constant 1.000000e+00 : f32
    %81 = vector.broadcast %cst_33 : f32 to vector<2x128xf32>
    %82 = arith.addf %81, %80 : vector<2x128xf32>
    %83 = arith.divf %81, %82 : vector<2x128xf32>
    %84 = vector.extract_strided_slice %77 {offsets = [0, 128], sizes = [2, 128], strides = [1, 1]} : vector<2x512xf32> to vector<2x128xf32>
    %85 = arith.negf %84 : vector<2x128xf32>
    %86 = math.exp %85 : vector<2x128xf32>
    %cst_34 = arith.constant 1.000000e+00 : f32
    %87 = vector.broadcast %cst_34 : f32 to vector<2x128xf32>
    %88 = arith.addf %87, %86 : vector<2x128xf32>
    %89 = arith.divf %87, %88 : vector<2x128xf32>
    %90 = vector.extract_strided_slice %77 {offsets = [0, 256], sizes = [2, 128], strides = [1, 1]} : vector<2x512xf32> to vector<2x128xf32>
    %91 = vector.extract_strided_slice %77 {offsets = [0, 384], sizes = [2, 128], strides = [1, 1]} : vector<2x512xf32> to vector<2x128xf32>
    %92 = arith.mulf %83, %91 : vector<2x128xf32>
    %93 = arith.addf %90, %92 : vector<2x128xf32>
    %94 = math.tanh %93 : vector<2x128xf32>
    %cst_35 = arith.constant 1.000000e+00 : f32
    %95 = vector.broadcast %cst_35 : f32 to vector<2x128xf32>
    %96 = arith.subf %95, %89 : vector<2x128xf32>
    %97 = arith.mulf %96, %94 : vector<2x128xf32>
    %98 = arith.mulf %89, %67 : vector<2x128xf32>
    %99 = arith.addf %97, %98 : vector<2x128xf32>
    %c1 = arith.constant 1 : index
    %c0_36 = arith.constant 0 : index
    %c0_37 = arith.constant 0 : index
    %100 = vector.load %arg9[%c1, %c0_36, %c0_37] : memref<2x2x128xf32, #tpu.memory_space<vmem>>, vector<1x2x128xf32>
    %101 = vector.shape_cast %100 : vector<1x2x128xf32> to vector<2x128xf32>
    %102 = vector.shape_cast %99 : vector<2x128xf32> to vector<1x2x128xf32>
    tpu.vector_store %arg9[%c1, %c0_36, %c0_37], %102 {strides = array<i32>} : memref<2x2x128xf32, #tpu.memory_space<vmem>>, vector<1x2x128xf32>,
    return
  }
  func.func @transform_0(%arg0: i32) -> (i32, i32) {
    %c0_i32 = arith.constant 0 : i32
    %c0_i32_0 = arith.constant 0 : i32
    return %arg0, %c0_i32 : i32, i32
  }
  func.func @transform_1(%arg0: i32) -> (i32, i32, i32) {
    %c0_i32 = arith.constant 0 : i32
    %c0_i32_0 = arith.constant 0 : i32
    %c0_i32_1 = arith.constant 0 : i32
    return %arg0, %c0_i32, %c0_i32_0 : i32, i32, i32
  }
  func.func @transform_2(%arg0: i32) -> (i32, i32, i32) {
    %c0_i32 = arith.constant 0 : i32
    %c0_i32_0 = arith.constant 0 : i32
    %c0_i32_1 = arith.constant 0 : i32
    return %c0_i32, %arg0, %c0_i32_0 : i32, i32, i32
  }
  func.func @transform_3(%arg0: i32) -> (i32, i32, i32) {
    %c0_i32 = arith.constant 0 : i32
    %c0_i32_0 = arith.constant 0 : i32
    %c0_i32_1 = arith.constant 0 : i32
    return %arg0, %c0_i32, %c0_i32_0 : i32, i32, i32
  }
  func.func @transform_4(%arg0: i32) -> (i32, i32) {
    %c0_i32 = arith.constant 0 : i32
    %c0_i32_0 = arith.constant 0 : i32
    %c0_i32_1 = arith.constant 0 : i32
    return %c0_i32, %c0_i32_0 : i32, i32
  }
  func.func @transform_5(%arg0: i32) -> (i32, i32) {
    %c0_i32 = arith.constant 0 : i32
    %c0_i32_0 = arith.constant 0 : i32
    %c0_i32_1 = arith.constant 0 : i32
    return %c0_i32, %c0_i32_0 : i32, i32
  }
  func.func @transform_6(%arg0: i32) -> (i32, i32) {
    %c0_i32 = arith.constant 0 : i32
    %c0_i32_0 = arith.constant 0 : i32
    %c0_i32_1 = arith.constant 0 : i32
    return %c0_i32, %c0_i32_0 : i32, i32
  }
  func.func @transform_7(%arg0: i32) -> (i32, i32) {
    %c0_i32 = arith.constant 0 : i32
    %c0_i32_0 = arith.constant 0 : i32
    %c0_i32_1 = arith.constant 0 : i32
    return %c0_i32, %c0_i32_0 : i32, i32
  }
  func.func @transform_8(%arg0: i32) -> (i32, i32, i32) {
    %c0_i32 = arith.constant 0 : i32
    %c0_i32_0 = arith.constant 0 : i32
    %c0_i32_1 = arith.constant 0 : i32
    return %c0_i32, %arg0, %c0_i32_0 : i32, i32, i32
  }
}

</mosaic_0001>

<bundles_post_ra>
// kernel: emotion_intent_decoder_forward.1
= control target key start
LH: loop header
LB: loop body
LE: loop exit
PB: predicated region body
PF: predicated region fallthrough
CT: control target
= control target key end

     0   :  { %13 = vsyncpa [#allocation3], 0  ;;  %s1503_s0 = inlined_call_operand.vmem [shape: f32[2,256], index: 0, kind: input, shape index: {}]   ;;  %s1504_s1 = inlined_call_operand.vmem [shape: bf16[2,8,128], index: 1, kind: input, shape index: {}]   ;;  %s1505_s2 = inlined_call_operand.vmem [shape: f32[2,2,128], index: 2, kind: input, shape index: {}]   ;;  %s1506_s3 = inlined_call_operand.vmem [shape: f32[2,8,1], index: 3, kind: input, shape index: {}]   ;;  %s1507_s4 = inlined_call_operand.hbm [shape: bf16[256,512], index: 4, kind: input, shape index: {}]   ;;  %s1508_s5 = inlined_call_operand.vmem [shape: f32[1,512], index: 5, kind: input, shape index: {}]   ;;  %s1509_s6 = inlined_call_operand.hbm [shape: bf16[128,512], index: 6, kind: input, shape index: {}]   ;;  %s1510_s7 = inlined_call_operand.vmem [shape: f32[1,512], index: 7, kind: input, shape index: {}]   ;;  %s1511_s8 = inlined_call_operand.vmem [shape: f32[2,2,128], index: 8, kind: output, shape index: {}]  }
   0x1   :  { %14 = vsyncpa [#allocation5], 0  ;;  %s1356_s27 = smov [#allocation2]   ;;  %s1308_s9 = scalar_lea.hbm %s1507_s4, 8192 }
   0x2   :  { %s28_s28 = sshll.u32 %s1356_s27, 4  ;;  %p1309_p0 = scmp.ne.s32.totalorder %s1507_s4, %s1308_s9  ;;  %s29_s28 = int_to_ptr.vmem [resolvable:$true] %s28_s28 }
   0x3   :  { %p1312_p1 = scmp.lt.u32.totalorder %s1308_s9, %s1507_s4 }
   0x5   :  { %p1314_p2 = pnand %p1312_p1, %p1309_p0 }
   0x7   :  { %1317 = shalt.err (!%p1314_p2)
}
   0x8   :  { %s1318_s14 = scalar_lea.vmem %s29_s28, 8192  ;;  %p1323_p4 = scmp.lt.s32.totalorder %s29_s28, %s29_s28 }
   0x9   :  { %p1319_p3 = scmp.ne.s32.totalorder %s29_s28, %s1318_s14  ;;  %p1324_p5 = scmp.lt.s32.totalorder %s1318_s14, %s1318_s14 }
   0xb   :  { %p1325_p6 = por %p1324_p5, %p1323_p4 }
   0xd   :  { %p1326_p7 = pnand %p1325_p6, %p1319_p3 }
   0xf   :  { %1329 = shalt.err (!%p1326_p7)
}
  0x10   :  { %s1357_s15 = smov 256   ;;  %s1358_s16 = smov 16  }
  0x11   :  { %34 = dma.hbm_to_vmem [thread:$0]  %s1507_s4, 8192, %s29_s28, [#allocation3], %s1357_s15, %s1357_s15, %s1358_s16  }
  0x12   :  { %s1359_s19 = smov [#allocation4]   ;;  %s1330_s23 = scalar_lea.hbm %s1509_s6, 4096 }
  0x13   :  { %s42_s20 = sshll.u32 %s1359_s19, 4  ;;  %p1331_p8 = scmp.ne.s32.totalorder %s1509_s6, %s1330_s23  ;;  %s43_s20 = int_to_ptr.vmem [resolvable:$true] %s42_s20 }
  0x14   :  { %p1334_p9 = scmp.lt.u32.totalorder %s1330_s23, %s1509_s6 }
  0x16   :  { %p1336_p10 = pnand %p1334_p9, %p1331_p8 }
  0x18   :  { %1339 = shalt.err (!%p1336_p10)
}
  0x19   :  { %s1340_s29 = scalar_lea.vmem %s43_s20, 4096  ;;  %p1345_p12 = scmp.lt.s32.totalorder %s43_s20, %s43_s20 }
  0x1a   :  { %p1341_p11 = scmp.ne.s32.totalorder %s43_s20, %s1340_s29  ;;  %p1346_p13 = scmp.lt.s32.totalorder %s1340_s29, %s1340_s29 }
  0x1c   :  { %p1347_p0 = por %p1346_p13, %p1345_p12 }
  0x1e   :  { %p1348_p1 = pnand %p1347_p0, %p1341_p11 }
  0x20   :  { %1351 = shalt.err (!%p1348_p1)
}
  0x21   :  { %48 = dma.hbm_to_vmem [thread:$0]  %s1509_s6, 4096, %s43_s20, [#allocation5], %s1357_s15, %s1357_s15, %s1358_s16  }
  0x22   :  { %1352 = dma.done.wait [#allocation3], 8192  }
  0x23   :  { %1353 = vsyncadd [#allocation3], 4294959104 }
  0x24   :  { %1354 = dma.done.wait [#allocation5], 4096  }
  0x25   :  { %1355 = vsyncadd [#allocation5], 4294963200  ;;  %v1360_v0 = vmov 1966171168   ;;  %v74_v2 = vlaneseq  ;;  %vm64_vm0 = vcmask 1041408   ;;  %v1450_v11 = vld [vmem:[%s1504_s1] sm:$0xff]  }
  0x26   :  { %v72_v1 = vunpack.c.l.s4 %v1360_v0  ;;  %v1437_v5 = vld [vmem:[%s1505_s2] sm:$0x3]  ;;  %v1442_v6 = vld [vmem:[%s1505_s2 + $0x2] sm:$0x3]  ;;  %v1125_v15 = vunpack.c.l.bf16 %v1450_v11  ;;  %v1126_v19 = vunpack.c.h.bf16 %v1450_v11  ;;  %v1361_v24 = vmov 0   ;;  %v144_v62 = vld [vmem:[%s1506_s3 + $0x8] sm:$0xff] }
  0x27   :  { %v1432_v4 = vshrl.u32 %v74_v2, 7  ;;  %v65_v7 = vsel %vm64_vm0, %v1437_v5, 0.0  ;;  %v66_v8 = vsel %vm64_vm0, %v1442_v6, 0.0  ;;  %1134 = vset.pattern.permute.xlu1 %v1361_v24  ;;  %1135 = vset.pattern.permute.xlu0 %v1361_v24  ;;  %v143_v58 = vld [vmem:[%s1506_s3] sm:$0xff]  ;;  %v1138_v2 = vld [vmem:[#allocation2 + $0xc] ss:$16 sps:$4 sm:$0xff]  }
  0x28   :  { %v73_v3 = vunpack.c.0.s8 %v72_v1  ;;  %v67_v9 = vadd.f32 %v66_v8, %v65_v7  ;;  %v1136_v1 = vld [vmem:[#allocation2 + $0x4] ss:$16 sps:$4 sm:$0xff]   ;;  %s1362_s15 = smov 32   ;;  %v1141_v7 = vld [vmem:[#allocation2 + $0x8] ss:$16 sps:$4 sm:$0xff]   ;;  %633 = vmatprep.subr.bf16.mxu1 %v1138_v2  ;;  %vm174_vm1 = vcmask 1041409  }
  0x29   :  { %v1453_v14 = vsub.s32 0, %v1432_v4  ;;  %v1142_v8 = vld [vmem:[#allocation2 + $0x24] ss:$16 sps:$4 sm:$0xff]   ;;  %592 = vmatprep.subr.bf16.mxu0 %v1136_v1  ;;  %634 = vmatpush1.bf16.msra.mxu1 %v1141_v7  ;;  %v1222_v2 = vld [vmem:[#allocation2 + $0x1cc] ss:$16 sps:$4 sm:$0xff]  }
  0x2a   :  { %v76_v10 = vsub.s32 %v73_v3, %v1432_v4  ;;  %v69_v12 = vmul.f32 0.5, %v67_v9  ;;  %v1140_v3 = vld [vmem:[#allocation2] ss:$16 sps:$4 sm:$0xff]   ;;  %v1144_v9 = vld [vmem:[#allocation2 + $0x2c] ss:$16 sps:$4 sm:$0xff]  }
  0x2b   :  { %593 = vmatpush1.bf16.msra.mxu0 %v1140_v3  ;;  %635 = vmatprep.subr.bf16.mxu1 %v1144_v9  ;;  %v1220_v1 = vld [vmem:[#allocation2 + $0x1c4] ss:$16 sps:$4 sm:$0xff]   ;;  %v1224_v3 = vld [vmem:[#allocation2 + $0x1c0] ss:$16 sps:$4 sm:$0xff]   ;;  %v1225_v7 = vld [vmem:[#allocation2 + $0x1c8] ss:$16 sps:$4 sm:$0xff]  }
  0x2c   :  { %v77_v13 = vrot.slane %v69_v12, %v76_v10  ;;  %v1147_v12 = vld [vmem:[#allocation2 + $0x28] ss:$16 sps:$4 sm:$0xff]   ;;  %594 = vmatprep.subr.bf16.mxu0 %v1142_v8  ;;  %v171_v8 = vld [vmem:[%s1503_s0] sm:$0xf] }
  0x2d   :  { %636 = vmatpush1.bf16.msra.mxu1 %v1147_v12  ;;  %v181_v12 = vrot.slane %v171_v8, 2 }
  0x2e   :  { %v85_v16 = vrot.slane %v77_v13, %v76_v10  ;;  %v78_v17 = vcombine.high %v77_v13, %v77_v13  ;;  %v1148_v13 = vld [vmem:[#allocation2 + $0x44] ss:$16 sps:$4 sm:$0xff]  }
  0x30   :  { %v96_v18 = vrot.slane %v85_v16, %v1453_v14  ;;  %v92_v20 = vrot.slane %v78_v17, %v76_v10  ;;  %v1146_v10 = vld [vmem:[#allocation2 + $0x20] ss:$16 sps:$4 sm:$0xff]   ;;  %v1150_v16 = vld [vmem:[#allocation2 + $0x4c] ss:$16 sps:$4 sm:$0xff]  }
  0x31   :  { %595 = vmatpush1.bf16.msra.mxu0 %v1146_v10  ;;  %v1152_v17 = vld [vmem:[#allocation2 + $0x40] ss:$16 sps:$4 sm:$0xff]   ;;  %637 = vmatprep.subr.bf16.mxu1 %v1150_v16 }
  0x32   :  { %v103_v21 = vmul.f32 %v1125_v15, %v96_v18  ;;  %v100_v22 = vrot.slane %v92_v20, %v1453_v14  ;;  %v1153_v18 = vld [vmem:[#allocation2 + $0x48] ss:$16 sps:$4 sm:$0xff]   ;;  %596 = vmatprep.subr.bf16.mxu0 %v1148_v13  ;;  %v1154_v20 = vld [vmem:[#allocation2 + $0x64] ss:$16 sps:$4 sm:$0xff]  }
  0x33   :  { %638 = vmatpush1.bf16.msra.mxu1 %v1153_v18 }
  0x34   :  { %105 = vadd.xlane.f32.xlu0 %v103_v21  ;;  %v104_v23 = vmul.f32 %v1126_v19, %v100_v22  ;;  %v1156_v21 = vld [vmem:[#allocation2 + $0x6c] ss:$16 sps:$4 sm:$0xff]   ;;  %v1158_v22 = vld [vmem:[#allocation2 + $0x60] ss:$16 sps:$4 sm:$0xff]  }
  0x35   :  { %597 = vmatpush1.bf16.msra.mxu0 %v1152_v17  ;;  %639 = vmatprep.subr.bf16.mxu1 %v1156_v21  ;;  %v1228_v21 = vld [vmem:[#allocation2 + $0x1ec] ss:$16 sps:$4 sm:$0xff]  }
  0x36   :  { %598 = vmatprep.subr.bf16.mxu0 %v1154_v20  ;;  %v1226_v20 = vld [vmem:[#allocation2 + $0x1e4] ss:$16 sps:$4 sm:$0xff]  }
  0x38   :  { %107 = vadd.xlane.f32.xlu0 %v104_v23  ;;  %v1159_v23 = vld [vmem:[#allocation2 + $0x68] ss:$16 sps:$4 sm:$0xff]  }
  0x39   :  { %599 = vmatpush1.bf16.msra.mxu0 %v1158_v22  ;;  %640 = vmatpush1.bf16.msra.mxu1 %v1159_v23  ;;  %v1230_v22 = vld [vmem:[#allocation2 + $0x1e0] ss:$16 sps:$4 sm:$0xff]   ;;  %v1231_v23 = vld [vmem:[#allocation2 + $0x1e8] ss:$16 sps:$4 sm:$0xff]  }
  0xc1   :  { %v106_v25 = vpop.xlane.xlu0 %105 }
  0xc2   :  { %v109_v26 = vrot.slane %v106_v25, 4 }
  0xc4   :  { %v110_v27 = vmax.f32 %v106_v25, %v109_v26  ;;  %v1162_v26 = vld [vmem:[#allocation2 + $0x8c] ss:$16 sps:$4 sm:$0xff]  }
  0xc5   :  { %v108_v28 = vpop.xlane.xlu0 %107  ;;  %641 = vmatprep.subr.bf16.mxu1 %v1162_v26 }
  0xc6   :  { %v111_v29 = vrot.slane %v110_v27, 2  ;;  %v115_v30 = vrot.slane %v108_v28, 4 }
  0xc8   :  { %v112_v31 = vmax.f32 %v110_v27, %v111_v29  ;;  %v116_v32 = vmax.f32 %v108_v28, %v115_v30  ;;  %v1164_v27 = vld [vmem:[#allocation2 + $0x80] ss:$16 sps:$4 sm:$0xff]   ;;  %v1166_v29 = vld [vmem:[#allocation2 + $0xa4] ss:$16 sps:$4 sm:$0xff]   ;;  %v1168_v30 = vld [vmem:[#allocation2 + $0xac] ss:$16 sps:$4 sm:$0xff]  }
  0xca   :  { %v113_v33 = vrot.slane %v112_v31, 1  ;;  %v117_v34 = vrot.slane %v116_v32, 2 }
  0xcc   :  { %v114_v35 = vmax.f32 %v112_v31, %v113_v33  ;;  %v118_v36 = vmax.f32 %v116_v32, %v117_v34  ;;  %v1170_v31 = vld [vmem:[#allocation2 + $0xa0] ss:$16 sps:$4 sm:$0xff]   ;;  %v1171_v32 = vld [vmem:[#allocation2 + $0xa8] ss:$16 sps:$4 sm:$0xff]   ;;  %v1172_v33 = vld [vmem:[#allocation2 + $0xc4] ss:$16 sps:$4 sm:$0xff]  }
  0xcd   :  { %v1174_v34 = vld [vmem:[#allocation2 + $0xcc] ss:$16 sps:$4 sm:$0xff]  }
  0xce   :  { %v121_v37 = vsub.f32 %v106_v25, %v114_v35  ;;  %v119_v38 = vrot.slane %v118_v36, 1  ;;  %v1160_v25 = vld [vmem:[#allocation2 + $0x84] ss:$16 sps:$4 sm:$0xff]   ;;  %v1176_v35 = vld [vmem:[#allocation2 + $0xc0] ss:$16 sps:$4 sm:$0xff]  }
  0xcf   :  { %600 = vmatprep.subr.bf16.mxu0 %v1160_v25  ;;  %v183_v25 = vadd.f32 %v181_v12, %v1437_v5 }
  0xd0   :  { %v123_v39 = vmul.f32 1.442695, %v121_v37  ;;  %v120_v40 = vmax.f32 %v118_v36, %v119_v38  ;;  %601 = vmatpush1.bf16.msra.mxu0 %v1164_v27  ;;  %v1177_v36 = vld [vmem:[#allocation2 + $0xc8] ss:$16 sps:$4 sm:$0xff]   ;;  %v1178_v37 = vld [vmem:[#allocation2 + $0xe4] ss:$16 sps:$4 sm:$0xff]  }
  0xd1   :  { %602 = vmatprep.subr.bf16.mxu0 %v1166_v29  ;;  %v1180_v38 = vld [vmem:[#allocation2 + $0xec] ss:$16 sps:$4 sm:$0xff]  }
  0xd2   :  { %1280 = vpow2.f32 %v123_v39  ;;  %v122_v41 = vsub.f32 %v108_v28, %v120_v40  ;;  %v1165_v28 = vld [vmem:[#allocation2 + $0x88] ss:$16 sps:$4 sm:$0xff]   ;;  %v1182_v39 = vld [vmem:[#allocation2 + $0xe0] ss:$16 sps:$4 sm:$0xff]  }
  0xd3   :  { %642 = vmatpush1.bf16.msra.mxu1 %v1165_v28  ;;  %v1183_v40 = vld [vmem:[#allocation2 + $0xe8] ss:$16 sps:$4 sm:$0xff]  }
  0xd4   :  { %v125_v42 = vmul.f32 1.442695, %v122_v41  ;;  %643 = vmatprep.subr.bf16.mxu1 %v1168_v30  ;;  %603 = vmatpush1.bf16.msra.mxu0 %v1170_v31  ;;  %v1184_v41 = vld [vmem:[#allocation2 + $0x104] ss:$16 sps:$4 sm:$0xff]  }
  0xd5   :  { %604 = vmatprep.subr.bf16.mxu0 %v1172_v33 }
  0xd6   :  { %1282 = vpow2.f32 %v125_v42  ;;  %v1186_v42 = vld [vmem:[#allocation2 + $0x10c] ss:$16 sps:$4 sm:$0xff]  }
  0xd7   :  { %644 = vmatpush1.bf16.msra.mxu1 %v1171_v32 }
  0xd8   :  { %645 = vmatprep.subr.bf16.mxu1 %v1174_v34  ;;  %605 = vmatpush1.bf16.msra.mxu0 %v1176_v35 }
  0xd9   :  { %606 = vmatprep.subr.bf16.mxu0 %v1178_v37 }
  0xdb   :  { %646 = vmatpush1.bf16.msra.mxu1 %v1177_v36 }
  0xdc   :  { %v1281_v43 = vpop.eup %1280  ;;  %647 = vmatprep.subr.bf16.mxu1 %v1180_v38  ;;  %607 = vmatpush1.bf16.msra.mxu0 %v1182_v39  ;;  %v1234_v38 = vld [vmem:[#allocation4 + $0x4] ss:$16 sps:$4 sm:$0xff]   ;;  %v1237_v39 = vld [vmem:[#allocation4 + $0xc] ss:$16 sps:$4 sm:$0xff]  }
  0xdd   :  { %v127_v44 = vrot.slane %v1281_v43, 4  ;;  %608 = vmatprep.subr.bf16.mxu0 %v1184_v41  ;;  %v1235_v41 = vld [vmem:[#allocation4 + $0x8] ss:$16 sps:$4 sm:$0xff]  }
  0xdf   :  { %v128_v45 = vadd.f32 %v1281_v43, %v127_v44  ;;  %648 = vmatpush1.bf16.msra.mxu1 %v1183_v40  ;;  %v1189_v44 = vld [vmem:[#allocation2 + $0x108] ss:$16 sps:$4 sm:$0xff]   ;;  %v1232_v40 = vld [vmem:[#allocation4] ss:$16 sps:$4 sm:$0xff]  }
  0xe0   :  { %v1283_v46 = vpop.eup %1282  ;;  %649 = vmatprep.subr.bf16.mxu1 %v1186_v42  ;;  %v1240_v42 = vld [vmem:[#allocation4 + $0x24] ss:$16 sps:$4 sm:$0xff]  }
  0xe1   :  { %v129_v47 = vrot.slane %v128_v45, 2  ;;  %v133_v48 = vrot.slane %v1283_v46, 4 }
  0xe3   :  { %v130_v49 = vadd.f32 %v129_v47, %v128_v45  ;;  %v134_v50 = vadd.f32 %v1283_v46, %v133_v48  ;;  %v1190_v45 = vld [vmem:[#allocation2 + $0x124] ss:$16 sps:$4 sm:$0xff]   ;;  %650 = vmatpush1.bf16.msra.mxu1 %v1189_v44  ;;  %v1194_v47 = vld [vmem:[#allocation2 + $0x120] ss:$16 sps:$4 sm:$0xff]   ;;  %v1195_v48 = vld [vmem:[#allocation2 + $0x128] ss:$16 sps:$4 sm:$0xff]  }
  0xe4   :  { %v1238_v44 = vld [vmem:[#allocation4 + $0x20] ss:$16 sps:$4 sm:$0xff]  }
  0xe5   :  { %v131_v51 = vrot.slane %v130_v49, 1  ;;  %v135_v52 = vrot.slane %v134_v50, 2 }
  0xe7   :  { %v132_v53 = vadd.f32 %v131_v51, %v130_v49  ;;  %v136_v54 = vadd.f32 %v135_v52, %v134_v50  ;;  %v1196_v49 = vld [vmem:[#allocation2 + $0x144] ss:$16 sps:$4 sm:$0xff]   ;;  %v1198_v50 = vld [vmem:[#allocation2 + $0x14c] ss:$16 sps:$4 sm:$0xff]   ;;  %v1200_v51 = vld [vmem:[#allocation2 + $0x140] ss:$16 sps:$4 sm:$0xff]  }
  0xe8   :  { %v1201_v52 = vld [vmem:[#allocation2 + $0x148] ss:$16 sps:$4 sm:$0xff]  }
  0xe9   :  { %1284 = vrcp.f32 %v132_v53  ;;  %v137_v55 = vrot.slane %v136_v54, 1  ;;  %v1202_v53 = vld [vmem:[#allocation2 + $0x164] ss:$16 sps:$4 sm:$0xff]  }
  0xeb   :  { %v138_v56 = vadd.f32 %v137_v55, %v136_v54  ;;  %v1204_v54 = vld [vmem:[#allocation2 + $0x16c] ss:$16 sps:$4 sm:$0xff]   ;;  %v1206_v55 = vld [vmem:[#allocation2 + $0x160] ss:$16 sps:$4 sm:$0xff]  }
  0xed   :  { %1286 = vrcp.f32 %v138_v56  ;;  %v1207_v56 = vld [vmem:[#allocation2 + $0x168] ss:$16 sps:$4 sm:$0xff]  }
  0xf3   :  { %v1285_v57 = vpop.eup %1284 }
  0xf4   :  { %v141_v59 = vmul.f32 %v1285_v57, %v1281_v43  ;;  %v1188_v43 = vld [vmem:[#allocation2 + $0x100] ss:$16 sps:$4 sm:$0xff]   ;;  %v1208_v57 = vld [vmem:[#allocation2 + $0x184] ss:$16 sps:$4 sm:$0xff]  }
  0xf5   :  { %609 = vmatpush1.bf16.msra.mxu0 %v1188_v43  ;;  %v1243_v43 = vld [vmem:[#allocation4 + $0x2c] ss:$16 sps:$4 sm:$0xff]  }
  0xf6   :  { %v145_v60 = vmul.f32 %v143_v58, %v141_v59  ;;  %610 = vmatprep.subr.bf16.mxu0 %v1190_v45  ;;  %v1210_v58 = vld [vmem:[#allocation2 + $0x18c] ss:$16 sps:$4 sm:$0xff]   ;;  %v1212_v59 = vld [vmem:[#allocation2 + $0x180] ss:$16 sps:$4 sm:$0xff]   ;;  %v1241_v45 = vld [vmem:[#allocation4 + $0x28] ss:$16 sps:$4 sm:$0xff]  }
  0xf7   :  { %v1287_v61 = vpop.eup %1286 }
  0xf8   :  { %149 = vperm.xlu1 %1134, %v145_v60   ;;  %v142_v63 = vmul.f32 %v1287_v61, %v1283_v46  ;;  %v1192_v46 = vld [vmem:[#allocation2 + $0x12c] ss:$16 sps:$4 sm:$0xff]   ;;  %v1213_v60 = vld [vmem:[#allocation2 + $0x188] ss:$16 sps:$4 sm:$0xff]   ;;  %v1214_v61 = vld [vmem:[#allocation2 + $0x1a4] ss:$16 sps:$4 sm:$0xff]  }
  0xf9   :  { %651 = vmatprep.subr.bf16.mxu1 %v1192_v46  ;;  %611 = vmatpush1.bf16.msra.mxu0 %v1194_v47  ;;  %v1246_v46 = vld [vmem:[#allocation4 + $0x44] ss:$16 sps:$4 sm:$0xff]   ;;  %v1249_v47 = vld [vmem:[#allocation4 + $0x4c] ss:$16 sps:$4 sm:$0xff]  }
  0xfa   :  { %v146_v0 = vmul.f32 %v144_v62, %v142_v63  ;;  %652 = vmatpush1.bf16.msra.mxu1 %v1195_v48  ;;  %612 = vmatprep.subr.bf16.mxu0 %v1196_v49  ;;  %v1216_v62 = vld [vmem:[#allocation2 + $0x1ac] ss:$16 sps:$4 sm:$0xff]   ;;  %v1218_v63 = vld [vmem:[#allocation2 + $0x1a0] ss:$16 sps:$4 sm:$0xff]   ;;  %v1252_v49 = vld [vmem:[#allocation4 + $0x64] ss:$16 sps:$4 sm:$0xff]  }
  0xfb   :  { %653 = vmatprep.subr.bf16.mxu1 %v1198_v50  ;;  %v1244_v48 = vld [vmem:[#allocation4 + $0x40] ss:$16 sps:$4 sm:$0xff]   ;;  %v1255_v50 = vld [vmem:[#allocation4 + $0x6c] ss:$16 sps:$4 sm:$0xff]  }
  0xfc   :  { %154 = vperm.xlu1 %1134, %v146_v0   ;;  %v1219_v0 = vld [vmem:[#allocation2 + $0x1a8] ss:$16 sps:$4 sm:$0xff]  }
  0xfd   :  { %613 = vmatpush1.bf16.msra.mxu0 %v1200_v51  ;;  %v1250_v51 = vld [vmem:[#allocation4 + $0x60] ss:$16 sps:$4 sm:$0xff]  }
  0xfe   :  { %654 = vmatpush1.bf16.msra.mxu1 %v1201_v52  ;;  %614 = vmatprep.subr.bf16.mxu0 %v1202_v53  ;;  %v1253_v52 = vld [vmem:[#allocation4 + $0x68] ss:$16 sps:$4 sm:$0xff]   ;;  %v1256_v53 = vld [vmem:[#allocation4 + $0x80] ss:$16 sps:$4 sm:$0xff]  }
  0xff   :  { %655 = vmatprep.subr.bf16.mxu1 %v1204_v54  ;;  %v1258_v54 = vld [vmem:[#allocation4 + $0x84] ss:$16 sps:$4 sm:$0xff]  }
 0x100   :  { %695 = vrot.lane.b32.xlu1 %v1442_v6, %s1362_s15 }
 0x101   :  { %615 = vmatpush1.bf16.msra.mxu0 %v1206_v55  ;;  %v1259_v55 = vld [vmem:[#allocation4 + $0x88] ss:$16 sps:$4 sm:$0xff]  }
 0x102   :  { %656 = vmatpush1.bf16.msra.mxu1 %v1207_v56  ;;  %616 = vmatprep.subr.bf16.mxu0 %v1208_v57  ;;  %v1261_v56 = vld [vmem:[#allocation4 + $0x8c] ss:$16 sps:$4 sm:$0xff]   ;;  %v1264_v57 = vld [vmem:[#allocation4 + $0xa4] ss:$16 sps:$4 sm:$0xff]  }
 0x103   :  { %657 = vmatprep.subr.bf16.mxu1 %v1210_v58  ;;  %v1267_v58 = vld [vmem:[#allocation4 + $0xac] ss:$16 sps:$4 sm:$0xff]  }
 0x105   :  { %617 = vmatpush1.bf16.msra.mxu0 %v1212_v59  ;;  %v1262_v59 = vld [vmem:[#allocation4 + $0xa0] ss:$16 sps:$4 sm:$0xff]  }
 0x106   :  { %658 = vmatpush1.bf16.msra.mxu1 %v1213_v60  ;;  %618 = vmatprep.subr.bf16.mxu0 %v1214_v61  ;;  %v1265_v60 = vld [vmem:[#allocation4 + $0xa8] ss:$16 sps:$4 sm:$0xff]   ;;  %v1270_v61 = vld [vmem:[#allocation4 + $0xc4] ss:$16 sps:$4 sm:$0xff]  }
 0x107   :  { %659 = vmatprep.subr.bf16.mxu1 %v1216_v62  ;;  %v1273_v62 = vld [vmem:[#allocation4 + $0xcc] ss:$16 sps:$4 sm:$0xff]  }
 0x109   :  { %619 = vmatpush1.bf16.msra.mxu0 %v1218_v63  ;;  %v1268_v63 = vld [vmem:[#allocation4 + $0xc0] ss:$16 sps:$4 sm:$0xff]  }
 0x10a   :  { %660 = vmatpush1.bf16.msra.mxu1 %v1219_v0  ;;  %620 = vmatprep.subr.bf16.mxu0 %v1220_v1  ;;  %v1271_v0 = vld [vmem:[#allocation4 + $0xc8] ss:$16 sps:$4 sm:$0xff]   ;;  %v1276_v1 = vld [vmem:[#allocation4 + $0xe4] ss:$16 sps:$4 sm:$0xff]  }
 0x10b   :  { %661 = vmatprep.subr.bf16.mxu1 %v1222_v2  ;;  %v1279_v2 = vld [vmem:[#allocation4 + $0xec] ss:$16 sps:$4 sm:$0xff]  }
 0x10d   :  { %621 = vmatpush1.bf16.msra.mxu0 %v1224_v3  ;;  %v1274_v3 = vld [vmem:[#allocation4 + $0xe0] ss:$16 sps:$4 sm:$0xff]  }
 0x10e   :  { %662 = vmatpush1.bf16.msra.mxu1 %v1225_v7  ;;  %622 = vmatprep.subr.bf16.mxu0 %v1226_v20  ;;  %v1277_v7 = vld [vmem:[#allocation4 + $0xe8] ss:$16 sps:$4 sm:$0xff]  }
 0x10f   :  { %663 = vmatprep.subr.bf16.mxu1 %v1228_v21 }
 0x111   :  { %623 = vmatpush1.bf16.msra.mxu0 %v1230_v22 }
 0x112   :  { %664 = vmatpush1.bf16.msra.mxu1 %v1231_v23  ;;  %913 = vmatprep.subr.bf16.mxu0 %v1234_v38 }
 0x113   :  { %954 = vmatprep.subr.bf16.mxu1 %v1237_v39 }
 0x177   :  { %v150_v9 = vpop.permute.xlu1 %149 }
 0x178   :  { %v157_v10 = vmul.f32 %v1125_v15, %v150_v9  ;;  %v185_v15 = vpack.c.bf16 %v183_v25, %v183_v25  ;;  %v258_v9 = vsub.s32 1, %v1432_v4 }
 0x17a   :  { %v159_v13 = vrot.slane %v157_v10, 4  ;;  %624 = vmatprep.mubr.bf16.mxu0 %v185_v15  ;;  %665 = vmatprep.mubr.bf16.mxu1 %v185_v15 }
 0x17b   :  { %v155_v16 = vpop.permute.xlu1 %154 }
 0x17c   :  { %v160_v17 = vadd.f32 %v159_v13, %v157_v10  ;;  %v158_v18 = vmul.f32 %v1126_v19, %v155_v16 }
 0x17e   :  { %v161_v26 = vrot.slane %v160_v17, 2  ;;  %v165_v27 = vrot.slane %v158_v18, 4 }
 0x180   :  { %v162_v28 = vadd.f32 %v161_v26, %v160_v17  ;;  %v166_v29 = vadd.f32 %v165_v27, %v158_v18 }
 0x182   :  { %v167_v30 = vrot.slane %v166_v29, 2  ;;  %v163_v11 = vrot.slane %v162_v28, 1 }
 0x184   :  { %v168_v19 = vadd.f32 %v167_v30, %v166_v29  ;;  %v164_v32 = vadd.f32 %v163_v11, %v162_v28  ;;  %v266_v30 = vsub.s32 3, %v1432_v4  ;;  %v262_v11 = vsub.s32 2, %v1432_v4 }
 0x186   :  { %v169_v31 = vrot.slane %v168_v19, 1 }
 0x188   :  { %v170_v33 = vadd.f32 %v169_v31, %v168_v19 }
 0x18a   :  { %v175_v34 = vsel %vm174_vm1, %v170_v33, %v164_v32 }
 0x18b   :  { %177 = vrot.lane.b32.xlu0 %v175_v34, %s1362_s15 }
 0x1fd   :  { %v178_v35 = vpop.permute.xlu0 %177 }
 0x1fe   :  { %v179_v36 = vadd.f32 %v178_v35, %v171_v8  ;;  %v250_v8 = vld [vmem:[%s1508_s5] sm:$0xf] }
 0x1ff   :  { %v255_v10 = vrot.slane %v250_v8, %v1453_v14  ;;  %v259_v16 = vrot.slane %v250_v8, %v258_v9  ;;  %v267_v31 = vrot.slane %v250_v8, %v266_v30  ;;  %v263_v32 = vrot.slane %v250_v8, %v262_v11 }
 0x200   :  { %v184_v37 = vpack.c.bf16 %v179_v36, %v179_v36 }
 0x202   :  { %625 = vmatmul.mubr.bf16.vlgmr.msra.gmra.mrb[0].mxu0 %v184_v37  ;;  %666 = vmatmul.mubr.bf16.vlgmr.msra.gmra.mrb[0].mxu1 %v184_v37 }
 0x203   :  { %945 = vmatprep.mubr.bf16.mxu0 %v1361_v24  ;;  %986 = vmatprep.mubr.bf16.mxu1 %v1361_v24  ;;  %v1247_v24 = vld [vmem:[#allocation4 + $0x48] ss:$16 sps:$4 sm:$0xff]  }
 0x204   :  { %914 = vmatpush1.bf16.msra.mxu0 %v1232_v40  ;;  %955 = vmatpush1.bf16.msra.mxu1 %v1235_v41 }
 0x205   :  { %915 = vmatprep.subr.bf16.mxu0 %v1240_v42  ;;  %956 = vmatprep.subr.bf16.mxu1 %v1243_v43 }
 0x208   :  { %916 = vmatpush1.bf16.msra.mxu0 %v1238_v44  ;;  %957 = vmatpush1.bf16.msra.mxu1 %v1241_v45  ;;  %v696_v44 = vpop.permute.xlu1 %695 }
 0x209   :  { %917 = vmatprep.subr.bf16.mxu0 %v1246_v46  ;;  %958 = vmatprep.subr.bf16.mxu1 %v1249_v47  ;;  %v731_v47 = vld [vmem:[%s1510_s7] sm:$0xf] }
 0x20c   :  { %918 = vmatpush1.bf16.msra.mxu0 %v1244_v48  ;;  %959 = vmatpush1.bf16.msra.mxu1 %v1247_v24  ;;  %v736_v48 = vrot.slane %v731_v47, %v1453_v14  ;;  %v748_v14 = vrot.slane %v731_v47, %v266_v30 }
 0x20d   :  { %919 = vmatprep.subr.bf16.mxu0 %v1252_v49  ;;  %960 = vmatprep.subr.bf16.mxu1 %v1255_v50  ;;  %v740_v50 = vrot.slane %v731_v47, %v258_v9 }
 0x210   :  { %920 = vmatpush1.bf16.msra.mxu0 %v1250_v51  ;;  %961 = vmatpush1.bf16.msra.mxu1 %v1253_v52 }
 0x211   :  { %921 = vmatprep.subr.bf16.mxu0 %v1258_v54  ;;  %962 = vmatprep.subr.bf16.mxu1 %v1261_v56 }
 0x214   :  { %922 = vmatpush1.bf16.msra.mxu0 %v1256_v53  ;;  %963 = vmatpush1.bf16.msra.mxu1 %v1259_v55 }
 0x215   :  { %923 = vmatprep.subr.bf16.mxu0 %v1264_v57  ;;  %964 = vmatprep.subr.bf16.mxu1 %v1267_v58 }
 0x218   :  { %924 = vmatpush1.bf16.msra.mxu0 %v1262_v59  ;;  %965 = vmatpush1.bf16.msra.mxu1 %v1265_v60 }
 0x219   :  { %925 = vmatprep.subr.bf16.mxu0 %v1270_v61  ;;  %966 = vmatprep.subr.bf16.mxu1 %v1273_v62 }
 0x21c   :  { %926 = vmatpush1.bf16.msra.mxu0 %v1268_v63  ;;  %967 = vmatpush1.bf16.msra.mxu1 %v1271_v0  ;;  %v744_v63 = vrot.slane %v731_v47, %v262_v11 }
 0x21d   :  { %927 = vmatprep.subr.bf16.mxu0 %v1276_v1  ;;  %968 = vmatprep.subr.bf16.mxu1 %v1279_v2 }
 0x220   :  { %928 = vmatpush1.bf16.msra.mxu0 %v1274_v3  ;;  %969 = vmatpush1.bf16.msra.mxu1 %v1277_v7 }
 0x2d5   :  { %v626_v12 = vpop.f32.mrb[0].mxu0  ;;  %v667_v13 = vpop.f32.mrb[0].mxu1 }
 0x2d6   :  { %v627_v17 = vadd.f32 %v626_v12, %v255_v10  ;;  %v628_v18 = vpop.f32.mrb[1].mxu0  ;;  %v669_v20 = vpop.f32.mrb[1].mxu1  ;;  %v668_v36 = vadd.f32 %v667_v13, %v263_v32 }
 0x2d7   :  { %v630_v21 = vpop.f32.mrb[2].mxu0  ;;  %v671_v22 = vpop.f32.mrb[2].mxu1  ;;  %v629_v27 = vadd.f32 %v628_v18, %v259_v16  ;;  %v670_v34 = vadd.f32 %v669_v20, %v267_v31 }
 0x2d8   :  { %v1086_v23 = vmul.f32 -1.442695, %v627_v17  ;;  %v631_v25 = vpop.f32.mrb[3].mxu0  ;;  %v672_v26 = vpop.f32.mrb[3].mxu1 }
 0x2d9   :  { %v1087_v15 = vmul.f32 -1.442695, %v629_v27 }
 0x2da   :  { %1288 = vpow2.f32 %v1086_v23 }
 0x2db   :  { %1290 = vpow2.f32 %v1087_v15 }
 0x2e4   :  { %v1289_v28 = vpop.eup %1288 }
 0x2e5   :  { %v677_v29 = vadd.f32 1.0, %v1289_v28  ;;  %v1291_v19 = vpop.eup %1290 }
 0x2e6   :  { %v683_v33 = vadd.f32 1.0, %v1291_v19 }
 0x2e7   :  { %1292 = vrcp.f32 %v677_v29 }
 0x2e8   :  { %1294 = vrcp.f32 %v683_v33 }
 0x2f1   :  { %v1293_v35 = vpop.eup %1292 }
 0x2f2   :  { %v686_v37 = vmul.f32 %v1293_v35, %v670_v34  ;;  %v1295_v39 = vpop.eup %1294 }
 0x2f3   :  { %v689_v40 = vsub.f32 1.0, %v1295_v39  ;;  %v691_v43 = vmul.f32 %v1295_v39, %v1437_v5 }
 0x2f4   :  { %v687_v38 = vadd.f32 %v686_v37, %v668_v36 }
 0x2f6   :  { %1296 = vtanh.f32 %v687_v38 }
 0x300   :  { %v1297_v41 = vpop.eup %1296 }
 0x301   :  { %v690_v42 = vmul.f32 %v1297_v41, %v689_v40 }
 0x303   :  { %v692_v45 = vadd.f32 %v691_v43, %v690_v42 }
 0x305   :  { %693 = vst [vmem:[%s1511_s8] sm:$0x3] %v692_v45  ;;  %v697_v4 = vadd.f32 %v696_v44, %v692_v45 }
 0x307   :  { %v698_v46 = vpack.c.bf16 %v697_v4, %v697_v4 }
 0x309   :  { %946 = vmatmul.mubr.bf16.vlgmr.msra.gmra.mrb[4].mxu0 %v698_v46  ;;  %987 = vmatmul.mubr.bf16.vlgmr.msra.gmra.mrb[4].mxu1 %v698_v46 }
 0x3dc   :  { %v947_v24 = vpop.f32.mrb[4].mxu0  ;;  %v988_v49 = vpop.f32.mrb[4].mxu1 }
 0x3dd   :  { %v948_v5 = vadd.f32 %v947_v24, %v736_v48  ;;  %v949_v51 = vpop.f32.mrb[5].mxu0  ;;  %v990_v52 = vpop.f32.mrb[5].mxu1  ;;  %v989_v3 = vadd.f32 %v988_v49, %v744_v63 }
 0x3de   :  { %v951_v53 = vpop.f32.mrb[6].mxu0  ;;  %v992_v54 = vpop.f32.mrb[6].mxu1  ;;  %v950_v58 = vadd.f32 %v949_v51, %v740_v50  ;;  %v991_v1 = vadd.f32 %v990_v52, %v748_v14 }
 0x3df   :  { %v1120_v55 = vmul.f32 -1.442695, %v948_v5  ;;  %v952_v56 = vpop.f32.mrb[7].mxu0  ;;  %v993_v57 = vpop.f32.mrb[7].mxu1 }
 0x3e0   :  { %v1121_v59 = vmul.f32 -1.442695, %v950_v58 }
 0x3e1   :  { %1298 = vpow2.f32 %v1120_v55 }
 0x3e2   :  { %1300 = vpow2.f32 %v1121_v59 }
 0x3eb   :  { %v1299_v60 = vpop.eup %1298 }
 0x3ec   :  { %v998_v61 = vadd.f32 1.0, %v1299_v60  ;;  %v1301_v62 = vpop.eup %1300 }
 0x3ed   :  { %v1004_v0 = vadd.f32 1.0, %v1301_v62 }
 0x3ee   :  { %1302 = vrcp.f32 %v998_v61 }
 0x3ef   :  { %1304 = vrcp.f32 %v1004_v0 }
 0x3f8   :  { %v1303_v2 = vpop.eup %1302 }
 0x3f9   :  { %v1007_v7 = vmul.f32 %v1303_v2, %v991_v1  ;;  %v1305_v9 = vpop.eup %1304 }
 0x3fa   :  { %v1010_v10 = vsub.f32 1.0, %v1305_v9  ;;  %v1012_v13 = vmul.f32 %v1305_v9, %v1442_v6 }
 0x3fb   :  { %v1008_v8 = vadd.f32 %v1007_v7, %v989_v3 }
 0x3fd   :  { %1306 = vtanh.f32 %v1008_v8 }
 0x407   :  { %v1307_v12 = vpop.eup %1306 }
 0x408   :  { %v1011_v16 = vmul.f32 %v1307_v12, %v1010_v10 }
 0x40a   :  { %v1013_v17 = vadd.f32 %v1012_v13, %v1011_v16 }
 0x40c   :  { %1122 = vst [vmem:[%s1511_s8 + $0x2] sm:$0x3] %v1013_v17 }
 0x40d   :  { %1020 = vsyncpa [#allocation3], 1 }
 0x40e   :  { %1021 = vsyncpa [#allocation5], 1 }

</bundles_post_ra>
